<compile_context>
chip_gen: v7x
topology: tpu7x:2x2x1
jax: 0.10.0
libtpu: 0.0.40
codegen_flags: <defaults>
</compile_context>

<pallas_src>
import functools

import jax
import jax.numpy as jnp
from jax.experimental import pallas as pl
from jax.experimental.pallas import tpu as pltpu

_NEG_BIG = -1e30  # f32 bias sentinel for padded vocab columns (exp underflows to 0)


def _round_up(x, m):
    return (x + m - 1) // m * m


def _vmem_capacity_bytes():
    """Per-core VMEM capacity; conservative 64 MiB fallback (v7x) if unknown."""
    try:
        return int(pltpu.get_tpu_info().vmem_capacity_bytes)
    except Exception:
        return 64 * 1024 * 1024


# ---------------------------------------------------------------------------
# Kernels
# ---------------------------------------------------------------------------
def _logsoftmax_proj_kernel(x_ref, w_ref, b_ref, o_ref):
    """Resident-vocab path: full (D, Vp) weight in VMEM, one-shot log-softmax.

    x_ref: (tm, D) bf16 | w_ref: (D, Vp) bf16 | b_ref: (1, Vp) f32
    o_ref: (tm, Vp)
    """
    logits = jnp.dot(x_ref[...], w_ref[...], preferred_element_type=jnp.float32)
    logits = logits + b_ref[...]
    m = jnp.max(logits, axis=-1, keepdims=True)
    lse = m + jnp.log(jnp.sum(jnp.exp(logits - m), axis=-1, keepdims=True))
    o_ref[...] = (logits - lse).astype(o_ref.dtype)


def _logsoftmax_proj_tiled_kernel(x_ref, w_ref, b_ref, o_ref, m_sc, l_sc):
    """Vocab-tiled two-pass log-softmax.

    grid = (row tiles, pass, vocab tiles); pass 0 accumulates per-row running
    max / sum-exp across vocab tiles, pass 1 recomputes the logits tile and
    emits `logits - lse`.

    x_ref: (tm, D) bf16 | w_ref: (D, tn) bf16 | b_ref: (1, tn) f32
    o_ref: (tm, tn)     | m_sc, l_sc: (tm, 1) f32 VMEM scratch
    """
    p = pl.program_id(1)
    j = pl.program_id(2)

    logits = jnp.dot(x_ref[...], w_ref[...], preferred_element_type=jnp.float32)
    logits = logits + b_ref[...]

    @pl.when(jnp.logical_and(p == 0, j == 0))
    def _():
        m_sc[...] = jnp.full_like(m_sc, -jnp.inf)
        l_sc[...] = jnp.zeros_like(l_sc)

    @pl.when(p == 0)
    def _():
        tile_max = jnp.max(logits, axis=-1, keepdims=True)
        m_new = jnp.maximum(m_sc[...], tile_max)
        l_sc[...] = (l_sc[...] * jnp.exp(m_sc[...] - m_new)
                     + jnp.sum(jnp.exp(logits - m_new), axis=-1, keepdims=True))
        m_sc[...] = m_new

    @pl.when(p == 1)
    def _():
        lse = m_sc[...] + jnp.log(l_sc[...])
        o_ref[...] = (logits - lse).astype(o_ref.dtype)


# ---------------------------------------------------------------------------
# Parameter preparation (hoist out of the per-call forward path)
# ---------------------------------------------------------------------------
def prepare_generator_params(weight, bias, *, compute_dtype=jnp.bfloat16):
    """Cast / pad the projection parameters once (cache the result).

    weight: (d_model, voc)  -- stored transposed vs. torch's nn.Linear.weight.
    bias:   (voc,)
    Returns (w, b2): w (D, Vp) compute_dtype, b2 (1, Vp) f32, Vp multiple of
    128. Padded vocab columns carry a -1e30 f32 bias so exp() underflows to 0
    and they never affect the log-softmax.
    """
    D, V = weight.shape
    Vp = _round_up(V, 128)
    w = weight.astype(compute_dtype)
    b2 = bias.astype(jnp.float32).reshape(1, V)
    if Vp != V:
        w = jnp.pad(w, ((0, 0), (0, Vp - V)))
        b2 = jnp.pad(b2, ((0, 0), (0, Vp - V)), constant_values=_NEG_BIG)
    return w, b2


# ---------------------------------------------------------------------------
# Forward
# ---------------------------------------------------------------------------
def generator_apply(x, w, b2, voc, *, tm=None, vocab_tile=None,
                    out_dtype=jnp.float32):
    """x: (B, S, D); w: (D, Vp) prepared; b2: (1, Vp) f32. Returns (B, S, voc)."""
    B, S, D = x.shape
    Dw, Vp = w.shape
    assert Dw == D, "weight must be stored transposed as (d_model, voc_padded)"
    assert Vp % 128 == 0 and Vp >= voc

    rows = B * S
    in_bytes = jnp.dtype(w.dtype).itemsize
    out_bytes = jnp.dtype(out_dtype).itemsize
    capacity = _vmem_capacity_bytes()

    if tm is None:
        # 256 on 128 MiB-VMEM parts (v5e/v6e), 128 on 64 MiB parts (v7x).
        tm = 256 if capacity >= 100 * 1024 * 1024 else 128
    # Shrink for tiny inputs; keep a multiple of 16 (bf16 sublane packing).
    tm = min(tm, _round_up(rows, 16))
    grid_rows = pl.cdiv(rows, tm)

    def single_pass_vmem():
        return (2 * tm * D * in_bytes          # x tiles (double-buffered)
                + D * Vp * in_bytes            # weight (single-buffered)
                + Vp * 4                       # bias (single-buffered)
                + 2 * tm * Vp * out_bytes      # output tiles (double-buffered)
                + tm * Vp * 4)                 # f32 logits temporary (x1)

    use_tiled = ((vocab_tile is not None and vocab_tile < Vp)
                 or single_pass_vmem() > 0.6 * capacity)

    x2 = x.reshape(rows, D).astype(w.dtype)

    if not use_tiled:
        vmem_est = single_pass_vmem()
        vmem_limit = int(min(max(1.25 * vmem_est, 16 * 1024 * 1024),
                             0.9 * capacity))
        out = pl.pallas_call(
            _logsoftmax_proj_kernel,
            out_shape=jax.ShapeDtypeStruct((rows, Vp), out_dtype),
            grid_spec=pltpu.PrefetchScalarGridSpec(
                num_scalar_prefetch=0,
                grid=(grid_rows,),
                in_specs=[
                    pl.BlockSpec((tm, D), lambda i: (i, 0)),
                    # Constant-index operands: single-buffered (no second copy
                    # of the (D, Vp) weight in VMEM).
                    pl.BlockSpec((D, Vp), lambda i: (0, 0),
                                 pipeline_mode=pl.Buffered(1)),
                    pl.BlockSpec((1, Vp), lambda i: (0, 0),
                                 pipeline_mode=pl.Buffered(1)),
                ],
                out_specs=pl.BlockSpec((tm, Vp), lambda i: (i, 0)),
            ),
            compiler_params=pltpu.CompilerParams(
                dimension_semantics=("parallel",),
                vmem_limit_bytes=vmem_limit,
            ),
            cost_estimate=pl.CostEstimate(
                flops=2 * rows * D * Vp,
                transcendentals=rows * Vp,
                bytes_accessed=(rows * D * in_bytes + D * Vp * in_bytes
                                + Vp * 4 + rows * Vp * out_bytes),
            ),
        )(x2, w, b2)
    else:
        if vocab_tile is None:
            # Largest 128-multiple tile dividing Vp whose weight/output tiles
            # stay comfortably inside VMEM.
            tn = 128
            for cand in (2048, 1024, 512, 256, 128):
                tile_bytes = (2 * D * cand * in_bytes
                              + 2 * tm * cand * out_bytes + tm * cand * 4)
                if Vp % cand == 0 and tile_bytes <= 0.5 * capacity:
                    tn = cand
                    break
        else:
            tn = vocab_tile
            assert tn % 128 == 0 and Vp % tn == 0
        nj = Vp // tn

        vmem_est = (2 * tm * D * in_bytes        # x tiles
                    + 2 * D * tn * in_bytes      # weight tiles (streamed)
                    + 2 * tn * 4                 # bias tiles
                    + 2 * tm * tn * out_bytes    # output tiles
                    + tm * tn * 4                # f32 logits temporary
                    + 2 * tm * 4)                # m / l scratch
        vmem_limit = int(min(max(1.25 * vmem_est, 16 * 1024 * 1024),
                             0.9 * capacity))

        out = pl.pallas_call(
            _logsoftmax_proj_tiled_kernel,
            out_shape=jax.ShapeDtypeStruct((rows, Vp), out_dtype),
            grid_spec=pltpu.PrefetchScalarGridSpec(
                num_scalar_prefetch=0,
                grid=(grid_rows, 2, nj),
                in_specs=[
                    pl.BlockSpec((tm, D), lambda i, p, j: (i, 0)),
                    pl.BlockSpec((D, tn), lambda i, p, j: (0, j)),
                    pl.BlockSpec((1, tn), lambda i, p, j: (0, j)),
                ],
                # Pass 0 writes nothing: collapse it onto block (i, 0) so each
                # output block is visited in one consecutive run and no
                # garbage block is ever flushed back to HBM.
                out_specs=pl.BlockSpec((tm, tn), lambda i, p, j: (i, j * p)),
                scratch_shapes=[
                    pltpu.VMEM((tm, 1), jnp.float32),   # running max
                    pltpu.VMEM((tm, 1), jnp.float32),   # running sum-exp
                ],
            ),
            compiler_params=pltpu.CompilerParams(
                dimension_semantics=("parallel", "arbitrary", "arbitrary"),
                vmem_limit_bytes=vmem_limit,
            ),
            cost_estimate=pl.CostEstimate(
                flops=2 * 2 * rows * D * Vp,           # matmul in both passes
                transcendentals=rows * Vp,
                bytes_accessed=(rows * D * in_bytes + 2 * D * Vp * in_bytes
                                + Vp * 4 + rows * Vp * out_bytes),
            ),
        )(x2, w, b2)

    out = out.reshape(B, S, Vp)
    if Vp != voc:            # only slice when vocab padding was actually needed
        out = out[..., :voc]
    return out


def generator_forward(x, weight, bias, *, tm=None, vocab_tile=None,
                      compute_dtype=jnp.bfloat16, out_dtype=jnp.float32):
    """Convenience wrapper: prepare params + apply.

    For repeated calls, call prepare_generator_params once and reuse the
    result with generator_apply (avoids re-reading/casting the weight every
    forward).
    """
    w, b2 = prepare_generator_params(weight, bias, compute_dtype=compute_dtype)
    return generator_apply(x, w, b2, weight.shape[1], tm=tm,
                           vocab_tile=vocab_tile, out_dtype=out_dtype)


# ---------------------------------------------------------------------------
# Self-test
# ---------------------------------------------------------------------------
if __name__ == "__main__":
    def reference(x2, weight, bias):
        # Matching bf16 operand rounding with f32 accumulation + f32 softmax.
        xb = x2.astype(jnp.bfloat16).astype(jnp.float32)
        wb = weight.astype(jnp.bfloat16).astype(jnp.float32)
        return jax.nn.log_softmax(xb @ wb + bias, axis=-1)

    key = jax.random.PRNGKey(0)
    cases = [
        # (B, S, D, V, vocab_tile)
        (2, 8, 32, 128, None),   # resident vocab tile (single-pass kernel)
        (2, 8, 32, 100, None),   # vocab padded to 128 (-1e30 bias columns)
        (2, 8, 32, 512, 128),    # forced vocab tiling -> two-pass log-softmax
    ]
    for idx, (B, S, D, V, tn) in enumerate(cases):
        kx, kw, kb, key = jax.random.split(jax.random.fold_in(key, idx), 4)
        x = jax.random.normal(kx, (B, S, D), dtype=jnp.float32)

        # Deterministic "Linear(d_model, voc)" params (torch-style uniform
        # init range +/- 1/sqrt(d_model)); stored transposed as (D, V).
        bound = 1.0 / (D ** 0.5)
        weight = jax.random.uniform(kw, (D, V), minval=-bound, maxval=bound,
                                    dtype=jnp.float32)
        bias = jax.random.uniform(kb, (V,), minval=-bound, maxval=bound,
                                  dtype=jnp.float32)

        fwd = jax.jit(functools.partial(generator_forward, vocab_tile=tn))
        out = jax.block_until_ready(fwd(x, weight, bias))

        ref = reference(x.reshape(-1, D), weight, bias).reshape(B, S, V)
        assert out.shape == (B, S, V), (out.shape, (B, S, V))
        err = float(jnp.max(jnp.abs(out - ref)))
        assert jnp.allclose(out, ref, atol=2e-3, rtol=2e-3), \
            f"case {idx}: max abs err {err}"

    print("KERNEL_OK")
</pallas_src>

<mosaic_0001>
module attributes {stable_mosaic.version = 11 : i64} {
  func.func @_logsoftmax_proj_kernel(%arg0: i32, %arg1: memref<16x32xbf16, #tpu.memory_space<vmem>>, %arg2: memref<32x128xbf16, #tpu.memory_space<vmem>>, %arg3: memref<1x128xf32, #tpu.memory_space<vmem>>, %arg4: memref<16x128xf32, #tpu.memory_space<vmem>>) attributes {dimension_semantics = [#tpu.dimension_semantics<parallel>], iteration_bounds = array<i64: 1>, scalar_prefetch = 0 : i64, scratch_operands = 0 : i64, tpu.core_type = #tpu.core_type<tc>, window_params = [{transform_indices = @transform_0, window_bounds = array<i64: 16, 32>}, {pipeline_mode = #tpu.pipeline_mode<synchronous>, transform_indices = @transform_1, window_bounds = array<i64: 32, 128>}, {pipeline_mode = #tpu.pipeline_mode<synchronous>, transform_indices = @transform_2, window_bounds = array<i64: 1, 128>}, {transform_indices = @transform_3, window_bounds = array<i64: 16, 128>}]} {
    %c0 = arith.constant 0 : index
    %c0_0 = arith.constant 0 : index
    %0 = vector.load %arg1[%c0, %c0_0] : memref<16x32xbf16, #tpu.memory_space<vmem>>, vector<16x32xbf16>
    %c0_1 = arith.constant 0 : index
    %c0_2 = arith.constant 0 : index
    %1 = vector.load %arg2[%c0_1, %c0_2] : memref<32x128xbf16, #tpu.memory_space<vmem>>, vector<32x128xbf16>
    %cst = arith.constant dense<0.000000e+00> : vector<16x128xf32>
    %2 = tpu.matmul %0, %1, %cst {dimension_numbers = #tpu.dot_dimension_numbers<[1], [0], [0], [1], [0, 0, 1, 1], [], []>} : vector<16x32xbf16>, vector<32x128xbf16>, vector<16x128xf32> -> vector<16x128xf32>
    %c0_3 = arith.constant 0 : index
    %c0_4 = arith.constant 0 : index
    %3 = vector.load %arg3[%c0_3, %c0_4] : memref<1x128xf32, #tpu.memory_space<vmem>>, vector<1x128xf32>
    %4 = vector.broadcast %3 : vector<1x128xf32> to vector<16x128xf32>
    %5 = arith.addf %2, %4 : vector<16x128xf32>
    %cst_5 = arith.constant dense<0xFF800000> : vector<16xf32>
    %6 = vector.multi_reduction <maximumf>, %5, %cst_5 [1] : vector<16x128xf32> to vector<16xf32>
    %7 = vector.shape_cast %6 : vector<16xf32> to vector<16x1xf32>
    %8 = vector.broadcast %7 : vector<16x1xf32> to vector<16x128xf32>
    %9 = arith.subf %5, %8 : vector<16x128xf32>
    %10 = math.exp %9 : vector<16x128xf32>
    %cst_6 = arith.constant dense<0.000000e+00> : vector<16xf32>
    %11 = vector.multi_reduction <add>, %10, %cst_6 [1] : vector<16x128xf32> to vector<16xf32>
    %12 = vector.shape_cast %11 : vector<16xf32> to vector<16x1xf32>
    %13 = math.log %12 : vector<16x1xf32>
    %14 = arith.addf %7, %13 : vector<16x1xf32>
    %15 = vector.broadcast %14 : vector<16x1xf32> to vector<16x128xf32>
    %16 = arith.subf %5, %15 : vector<16x128xf32>
    %c0_7 = arith.constant 0 : index
    %c0_8 = arith.constant 0 : index
    %17 = vector.load %arg4[%c0_7, %c0_8] : memref<16x128xf32, #tpu.memory_space<vmem>>, vector<16x128xf32>
    tpu.vector_store %arg4[%c0_7, %c0_8], %16 {strides = array<i32>} : memref<16x128xf32, #tpu.memory_space<vmem>>, vector<16x128xf32>,
    return
  }
  func.func @transform_0(%arg0: i32) -> (i32, i32) {
    %c0_i32 = arith.constant 0 : i32
    %c0_i32_0 = arith.constant 0 : i32
    return %arg0, %c0_i32 : i32, i32
  }
  func.func @transform_1(%arg0: i32) -> (i32, i32) {
    %c0_i32 = arith.constant 0 : i32
    %c0_i32_0 = arith.constant 0 : i32
    %c0_i32_1 = arith.constant 0 : i32
    return %c0_i32, %c0_i32_0 : i32, i32
  }
  func.func @transform_2(%arg0: i32) -> (i32, i32) {
    %c0_i32 = arith.constant 0 : i32
    %c0_i32_0 = arith.constant 0 : i32
    %c0_i32_1 = arith.constant 0 : i32
    return %c0_i32, %c0_i32_0 : i32, i32
  }
  func.func @transform_3(%arg0: i32) -> (i32, i32) {
    %c0_i32 = arith.constant 0 : i32
    %c0_i32_0 = arith.constant 0 : i32
    return %arg0, %c0_i32 : i32, i32
  }
}

</mosaic_0001>

<bundles_post_ra>
// kernel: generator_forward.1
= control target key start
LH: loop header
LB: loop body
LE: loop exit
PB: predicated region body
PF: predicated region fallthrough
CT: control target
= control target key end

     0   :  { %v187_v1 = vmov 0.0   ;;  %vm188_vm0 = vmmov 0   ;;  %s236_s0 = inlined_call_operand.vmem [shape: bf16[16,32], index: 0, kind: input, shape index: {}]   ;;  %s237_s1 = inlined_call_operand.vmem [shape: bf16[32,128], index: 1, kind: input, shape index: {}]   ;;  %s238_s2 = inlined_call_operand.vmem [shape: f32[1,128], index: 2, kind: input, shape index: {}]   ;;  %s239_s3 = inlined_call_operand.hbm [shape: f32[16,128], index: 3, kind: output, shape index: {}]  }
   0x1   :  { %v152_v0 = vld [vmem:[%s237_s1] sm:$0xff]   ;;  %139 = vmatprep.subr.bf16.mxu0 %v187_v1  ;;  %v153_v2 = vld [vmem:[%s237_s1 + $0x8] sm:$0xff]   ;;  %143 = vmatprep.mubr.msk.bf16.mxu0 %vm188_vm0, %v187_v1 }
   0x2   :  { %140 = vmatpush3.bf16.msra.mxu0 %v152_v0 }
   0x3   :  { %141 = vmatprep.subr.bf16.mxu0 %v187_v1 }
   0x4   :  { %8 = vsyncpa [#allocation3], 0  ;;  %v154_v3 = vld [vmem:[%s236_s0] sm:$0xff]   ;;  %vm46_vm1 = vcmask 261120   ;;  %s189_s0 = smov [#allocation2]  }
   0x5   :  { %v131_v4 = vld [vmem:[%s238_s2] ss:$0 sm:$0xff]  ;;  %s120_s1 = sshll.u32 %s189_s0, 4  ;;  %s121_s1 = int_to_ptr.vmem [resolvable:$true] %s120_s1 }
   0x6   :  { %142 = vmatpush3.bf16.msra.mxu0 %v153_v2  ;;  %s163_s2 = scalar_lea.vmem %s121_s1, 256  ;;  %p168_p1 = scmp.lt.s32.totalorder %s121_s1, %s121_s1 }
   0x7   :  { %p164_p0 = scmp.ne.s32.totalorder %s121_s1, %s163_s2  ;;  %p169_p2 = scmp.lt.s32.totalorder %s163_s2, %s163_s2 }
   0x9   :  { %144 = vmatmul.mubr.msk.bf16.vlgmr.msra.gmra.mrb[0].mxu0 %vm46_vm1, %v154_v3  ;;  %p170_p3 = por %p169_p2, %p168_p1 }
   0xb   :  { %p171_p4 = pnand %p170_p3, %p164_p0 }
  0xdc   :  { %v84_v5 = vpop.f32.mrb[0].mxu0 }
  0xdd   :  { %v85_v6 = vadd.f32 %v131_v4, %v84_v5  ;;  %v145_v7 = vpop.f32.mrb[1].mxu0 }
  0xde   :  { %v87_v8 = vpop.f32.mrb[2].mxu0 }
  0xdf   :  { %91 = vmax.xlane.f32.xlu0 %v85_v6  ;;  %v146_v9 = vpop.f32.mrb[3].mxu0  ;;  %v88_v10 = vadd.f32 %v131_v4, %v87_v8 }
  0xe3   :  { %93 = vmax.xlane.f32.xlu0 %v88_v10 }
 0x16c   :  { %v92_v11 = vpop.xlane.xlu0 %91 }
 0x16d   :  { %v95_v12 = vsub.f32 %v85_v6, %v92_v11 }
 0x16f   :  { %v97_v13 = vmul.f32 1.442695, %v95_v12 }
 0x170   :  { %v94_v14 = vpop.xlane.xlu0 %93 }
 0x171   :  { %v96_v15 = vsub.f32 %v88_v10, %v94_v14  ;;  %155 = vpow2.f32 %v97_v13 }
 0x173   :  { %v99_v16 = vmul.f32 1.442695, %v96_v15 }
 0x175   :  { %157 = vpow2.f32 %v99_v16 }
 0x17b   :  { %v156_v17 = vpop.eup %155 }
 0x17c   :  { %101 = vadd.xlane.f32.xlu1 %v156_v17 }
 0x17f   :  { %v158_v18 = vpop.eup %157 }
 0x180   :  { %103 = vadd.xlane.f32.xlu1 %v158_v18 }
 0x209   :  { %v102_v19 = vpop.xlane.xlu1 %101 }
 0x20a   :  { %159 = vlog2.f32 %v102_v19 }
 0x20d   :  { %v104_v20 = vpop.xlane.xlu1 %103 }
 0x20e   :  { %161 = vlog2.f32 %v104_v20 }
 0x214   :  { %v160_v21 = vpop.eup %159 }
 0x215   :  { %v106_v22 = vmul.f32 0.6931472, %v160_v21 }
 0x217   :  { %v109_v23 = vadd.f32 %v106_v22, %v92_v11 }
 0x218   :  { %v162_v24 = vpop.eup %161 }
 0x219   :  { %v111_v25 = vsub.f32 %v85_v6, %v109_v23  ;;  %v108_v26 = vmul.f32 0.6931472, %v162_v24 }
 0x21b   :  { %113 = vst [vmem:[#allocation2] sm:$0xff] %v111_v25  ;;  %v110_v27 = vadd.f32 %v108_v26, %v94_v14 }
 0x21d   :  { %v112_v28 = vsub.f32 %v88_v10, %v110_v27 }
 0x21f   :  { %114 = vst [vmem:[#allocation2 + $0x8] sm:$0xff] %v112_v28 }
 0x220   :  { %174 = shalt.err (!%p171_p4)
}
 0x221   :  { %s175_s22 = scalar_lea.hbm %s239_s3, 256 }
 0x222   :  { %p176_p5 = scmp.ne.s32.totalorder %s239_s3, %s175_s22  ;;  %p179_p6 = scmp.lt.u32.totalorder %s175_s22, %s239_s3 }
 0x224   :  { %p181_p7 = pnand %p179_p6, %p176_p5 }
 0x226   :  { %184 = shalt.err (!%p181_p7)
}
 0x227   :  { %s190_s27 = smov 128   ;;  %s191_s28 = smov 8  }
 0x228   :  { %126 = dma.vmem_to_hbm [thread:$0]  %s121_s1, 256, %s239_s3, [#allocation3], %s190_s27, %s190_s27, %s191_s28  }
 0x229   :  { %185 = dma.done.wait [#allocation3], 256  }
 0x22a   :  { %186 = vsyncadd [#allocation3], 4294967040 }
 0x22b   :  { %130 = vsyncpa [#allocation3], 1 }

</bundles_post_ra>
